<compile_context>
chip_gen: v5e
topology: v5e:2x2
jax: 0.10.0
libtpu: 0.0.40
codegen_flags: <defaults>
</compile_context>

<pallas_src>
from typing import NamedTuple

import jax
import jax.numpy as jnp
from jax.experimental import pallas as pl
from jax.experimental.pallas import tpu as pltpu


def _round_up(a: int, b: int) -> int:
    return ((a + b - 1) // b) * b


def _cdiv(a: int, b: int) -> int:
    return (a + b - 1) // b


def _vmem_capacity_bytes() -> int:
    """Physical VMEM per TensorCore; falls back to the smallest (v7x) size."""
    try:
        return int(pltpu.get_tpu_info().vmem_capacity_bytes)
    except Exception:
        return 64 << 20


def _vmem_budget_bytes() -> int:
    cap = _vmem_capacity_bytes()
    headroom = max(8 << 20, cap // 8)     # leave compiler-internal scratch room
    return max(cap - headroom, 16 << 20)  # ~56 MiB on v7x, ~112 MiB on v5e/v6e


def _weight_spec(block_shape, index_map, buffers: int, steps: int):
    """BlockSpec for a streamed weight chunk, optionally >2-deep buffered."""
    if buffers > 2 and steps >= buffers and hasattr(pl, "Buffered"):
        try:
            return pl.BlockSpec(block_shape, index_map,
                                pipeline_mode=pl.Buffered(buffers))
        except TypeError:
            pass  # older jax: fall back to default double buffering
    return pl.BlockSpec(block_shape, index_map)


# ----------------------------------------------------------------------------
# Kernels.  Grid = (m tiles, output-dim tiles, ff reduction tiles); the ff
# axis is last ("arbitrary"), the output block stays resident across it.
# ----------------------------------------------------------------------------

def _ffn_kernel_acc(x_ref, w1_ref, b1_ref, w2_ref, b2_ref, o_ref, acc_ref):
    # x_ref:   (tm, dim_p)   compute dtype, resident across (j, k)
    # w1_ref:  (dim_p, tk)   W1 ff-chunk
    # b1_ref:  (1, tk)       f32
    # w2_ref:  (tk, tn)      W2 (ff-chunk, out-chunk)
    # b2_ref:  (1, tn)       f32
    # o_ref:   (tm, tn)      output dtype (non-f32 path)
    # acc_ref: (tm, tn)      f32 VMEM accumulator
    k = pl.program_id(2)

    @pl.when(k == 0)
    def _():
        acc_ref[...] = jnp.zeros_like(acc_ref)

    h = jnp.dot(x_ref[...], w1_ref[...], preferred_element_type=jnp.float32)
    h = jnp.maximum(h + b1_ref[...], 0.0)
    acc_ref[...] += jnp.dot(h.astype(w2_ref.dtype), w2_ref[...],
                            preferred_element_type=jnp.float32)

    @pl.when(k == pl.num_programs(2) - 1)
    def _():
        o_ref[...] = (acc_ref[...] + b2_ref[...]).astype(o_ref.dtype)


def _ffn_kernel_f32out(x_ref, w1_ref, b1_ref, w2_ref, b2_ref, o_ref):
    # f32 outputs: accumulate straight into the resident output block
    # (saves tm*tn*4 bytes of scratch and the finalize copy).
    k = pl.program_id(2)

    @pl.when(k == 0)
    def _():
        o_ref[...] = jnp.zeros_like(o_ref)

    h = jnp.dot(x_ref[...], w1_ref[...], preferred_element_type=jnp.float32)
    h = jnp.maximum(h + b1_ref[...], 0.0)
    o_ref[...] += jnp.dot(h.astype(w2_ref.dtype), w2_ref[...],
                          preferred_element_type=jnp.float32)

    @pl.when(k == pl.num_programs(2) - 1)
    def _():
        o_ref[...] += b2_ref[...]


# ----------------------------------------------------------------------------
# Weight preparation (hoisted: pad + cast once, reuse across calls).
# ----------------------------------------------------------------------------

class FFNParams(NamedTuple):
    w1: jax.Array      # (dim_p, ff_p)  compute dtype
    b1: jax.Array      # (1, ff_p)      f32
    w2: jax.Array      # (ff_p, dim_p)  compute dtype
    b2: jax.Array      # (1, dim_p)     f32
    dim: int
    ff_dim: int
    dim_p: int
    ff_p: int
    tk: int            # ff reduction chunk
    tn: int            # output-feature chunk


def prepare_ffn_params(w1, b1, w2, b2, *, compute_dtype=jnp.bfloat16,
                       tk_ff=1024, tn=2048, tm_hint=512, weight_buffers=3,
                       vmem_budget=None):
    """Pad + cast the FFN weights once and fix the feature-dim tiling."""
    dim, ff_dim = w1.shape
    assert w2.shape == (ff_dim, dim)
    assert b1.shape == (ff_dim,) and b2.shape == (dim,)
    if vmem_budget is None:
        vmem_budget = _vmem_budget_bytes()

    # 256-lane alignment fills v6e/v7x's 256-wide MXU; 128 is the hard floor.
    lane = 256 if min(dim, ff_dim) >= 256 else 128
    dim_p0 = _round_up(dim, lane)
    ff_p0 = _round_up(ff_dim, lane)

    tk = min(_round_up(max(tk_ff, lane), lane), _round_up(ff_p0, lane))
    tn_req = _round_up(max(tn, lane), lane)
    tn_eff = dim_p0 if dim_p0 <= tn_req else tn_req

    cbytes = jnp.dtype(compute_dtype).itemsize
    nb = max(2, weight_buffers)

    def est(tk_, tn_):
        return int(2 * tm_hint * dim_p0 * cbytes       # x tile
                   + nb * dim_p0 * tk_ * cbytes        # W1 chunk stream
                   + nb * tk_ * tn_ * cbytes           # W2 chunk stream
                   + 2 * tk_ * 4 + 2 * tn_ * 4         # bias chunks
                   + 2 * tm_hint * tn_ * 4             # output tile (worst f32)
                   + tm_hint * tn_ * 4                 # f32 accumulator
                   + tm_hint * tk_ * (4 + cbytes))     # h + its cast

    # Shrink the ff chunk first, then the output chunk, until we fit.
    while est(tk, tn_eff) > vmem_budget and tk > lane:
        tk = max(lane, _round_up(tk // 2, lane))
    while est(tk, tn_eff) > vmem_budget and tn_eff > lane:
        tn_eff = max(lane, _round_up(tn_eff // 2, lane))

    ff_p = _round_up(ff_p0, tk)
    dim_p = _round_up(dim_p0, tn_eff)

    w1p = jnp.pad(w1, ((0, dim_p - dim), (0, ff_p - ff_dim))).astype(compute_dtype)
    w2p = jnp.pad(w2, ((0, ff_p - ff_dim), (0, dim_p - dim))).astype(compute_dtype)
    b1p = jnp.pad(b1.astype(jnp.float32), (0, ff_p - ff_dim)).reshape(1, ff_p)
    b2p = jnp.pad(b2.astype(jnp.float32), (0, dim_p - dim)).reshape(1, dim_p)
    return FFNParams(w1p, b1p, w2p, b2p, dim, ff_dim, dim_p, ff_p, tk, tn_eff)


# ----------------------------------------------------------------------------
# Kernel wrapper.
# ----------------------------------------------------------------------------

def ffn_apply(x, params: FFNParams, *, tm=512, weight_buffers=3,
              vmem_budget=None):
    """y = relu(x @ W1 + b1) @ W2 + b2 with pre-prepared (padded) weights."""
    dim, ff_dim = params.dim, params.ff_dim
    dim_p, ff_p, tk, tn = params.dim_p, params.ff_p, params.tk, params.tn
    compute_dtype = params.w1.dtype
    out_dtype = x.dtype

    assert x.shape[-1] == dim
    lead_shape = x.shape[:-1]
    x2 = x.reshape(-1, dim)
    m = x2.shape[0]

    if vmem_budget is None:
        vmem_budget = _vmem_budget_bytes()

    n_n = dim_p // tn
    n_k = ff_p // tk

    # ---- row tile: fill the MXU M dimension; skinny tiles only for tiny m --
    tm_eff = min(tm, _round_up(m, 16))
    if tm_eff >= 256:
        tm_eff = _round_up(tm_eff, 256)
    elif tm_eff >= 128:
        tm_eff = _round_up(tm_eff, 128)
    else:
        tm_eff = _round_up(tm_eff, 16)

    # v7x has 2 TensorCores sharing the parallel grid axes: if there is only
    # one (m, n) tile, split the rows so both cores get work.
    if n_n == 1 and _cdiv(m, tm_eff) == 1 and m > 32:
        tm_eff = max(16, _round_up(_cdiv(m, 2), 16))
        if tm_eff >= 128:
            tm_eff = _round_up(tm_eff, 128)

    # ---- per-call VMEM check (feature tiling is fixed by params) -----------
    cbytes = jnp.dtype(compute_dtype).itemsize
    obytes = jnp.dtype(out_dtype).itemsize
    use_scratch = jnp.dtype(out_dtype) != jnp.dtype(jnp.float32)
    nb = max(2, weight_buffers)

    def est(tm_):
        e = (2 * tm_ * dim_p * cbytes
             + nb * dim_p * tk * cbytes
             + nb * tk * tn * cbytes
             + 2 * tk * 4 + 2 * tn * 4
             + 2 * tm_ * tn * obytes
             + tm_ * tk * (4 + cbytes))
        if use_scratch:
            e += tm_ * tn * 4
        return int(e)

    while est(tm_eff) > vmem_budget and tm_eff > 16:
        tm_eff = max(16, _round_up(tm_eff // 2, 16))

    m_p = _round_up(m, tm_eff)
    n_m = m_p // tm_eff
    grid = (n_m, n_n, n_k)

    # Only x is padded/cast per call; weights were prepared once.
    x_pad = jnp.pad(x2, ((0, m_p - m), (0, dim_p - dim))).astype(compute_dtype)

    cap = _vmem_capacity_bytes()
    vmem_limit = min(max(int(est(tm_eff) * 1.5) + (4 << 20), 32 << 20),
                     max(cap - (8 << 20), 32 << 20))

    # Weights are re-streamed once per (row, output) tile.
    cost = pl.CostEstimate(
        flops=int(2 * m_p * dim_p * ff_p * (n_n + 1)),
        transcendentals=0,
        bytes_accessed=int(
            m_p * dim_p * cbytes                    # x (read once per row tile)
            + n_m * n_n * dim_p * ff_p * cbytes     # W1 per (m, n) tile
            + n_m * ff_p * dim_p * cbytes           # W2 per m tile
            + n_m * n_n * ff_p * 4 + n_m * dim_p * 4
            + m_p * dim_p * obytes),
    )

    in_specs = [
        pl.BlockSpec((tm_eff, dim_p), lambda i, j, k: (i, 0)),          # x
        _weight_spec((dim_p, tk), lambda i, j, k: (0, k),
                     weight_buffers, n_k),                              # W1
        pl.BlockSpec((1, tk), lambda i, j, k: (0, k)),                  # b1
        _weight_spec((tk, tn), lambda i, j, k: (k, j),
                     weight_buffers, n_k),                              # W2
        pl.BlockSpec((1, tn), lambda i, j, k: (0, j)),                  # b2
    ]
    out_spec = pl.BlockSpec((tm_eff, tn), lambda i, j, k: (i, j))

    if use_scratch:
        kernel = _ffn_kernel_acc
        scratch_shapes = [pltpu.VMEM((tm_eff, tn), jnp.float32)]
    else:
        kernel = _ffn_kernel_f32out
        scratch_shapes = []

    out = pl.pallas_call(
        kernel,
        out_shape=jax.ShapeDtypeStruct((m_p, dim_p), out_dtype),
        grid_spec=pltpu.PrefetchScalarGridSpec(
            num_scalar_prefetch=0,
            grid=grid,
            in_specs=in_specs,
            out_specs=out_spec,
            scratch_shapes=scratch_shapes,
        ),
        compiler_params=pltpu.CompilerParams(
            dimension_semantics=("parallel", "parallel", "arbitrary"),
            vmem_limit_bytes=vmem_limit,
        ),
        cost_estimate=cost,
    )(x_pad, params.w1, params.b1, params.w2, params.b2)

    return out[:m, :dim].reshape(*lead_shape, dim)


def ffn_pallas(x, w1, b1, w2, b2, *, compute_dtype=jnp.bfloat16, tm=512,
               tk_ff=1024, tn=2048, weight_buffers=3):
    """Convenience wrapper: prepare weights + apply (prefer caching params)."""
    params = prepare_ffn_params(w1, b1, w2, b2, compute_dtype=compute_dtype,
                                tk_ff=tk_ff, tn=tn, tm_hint=tm,
                                weight_buffers=weight_buffers)
    return ffn_apply(x, params, tm=tm, weight_buffers=weight_buffers)


# ----------------------------------------------------------------------------
# Reference + init helpers.
# ----------------------------------------------------------------------------

def init_ffn_params(key, dim, ff_dim, dtype=jnp.float32):
    """Deterministic init mimicking nn.Linear's uniform(-1/sqrt(fan_in), ...)."""
    k1, k2, k3, k4 = jax.random.split(key, 4)
    bound1 = 1.0 / (dim ** 0.5)
    bound2 = 1.0 / (ff_dim ** 0.5)
    # Stored already transposed to (in, out) for the kernel.
    w1 = jax.random.uniform(k1, (dim, ff_dim), dtype, minval=-bound1, maxval=bound1)
    b1 = jax.random.uniform(k2, (ff_dim,), dtype, minval=-bound1, maxval=bound1)
    w2 = jax.random.uniform(k3, (ff_dim, dim), dtype, minval=-bound2, maxval=bound2)
    b2 = jax.random.uniform(k4, (dim,), dtype, minval=-bound2, maxval=bound2)
    return w1, b1, w2, b2


def ffn_reference(x, w1, b1, w2, b2):
    h = jnp.maximum(jnp.dot(x, w1) + b1, 0.0)
    return jnp.dot(h, w2) + b2


if __name__ == "__main__":
    # ---- small shapes matching the module's typical use ---------------------
    batch, seq, dim, ff_dim = 2, 8, 32, 64

    key = jax.random.PRNGKey(0)
    kx, kp = jax.random.split(key)
    x = jax.random.normal(kx, (batch, seq, dim), jnp.float32)
    w1, b1, w2, b2 = init_ffn_params(kp, dim, ff_dim)
    ref = ffn_reference(x, w1, b1, w2, b2)

    # f32 compute path: tight tolerance (faithful nn.Linear semantics).
    out_f32 = jax.block_until_ready(
        ffn_pallas(x, w1, b1, w2, b2, compute_dtype=jnp.float32))
    assert out_f32.shape == x.shape
    assert jnp.allclose(out_f32, ref, atol=1e-5, rtol=1e-5)

    # bf16 compute path (default, MXU-fast) with hoisted weight prep reused
    # across two calls (decode-style: only x is padded/cast per call).
    params_bf16 = prepare_ffn_params(w1, b1, w2, b2)
    out_bf16 = jax.block_until_ready(ffn_apply(x, params_bf16))
    assert out_bf16.shape == x.shape
    assert jnp.allclose(out_bf16, ref, atol=5e-2, rtol=5e-2)

    # Ragged token count (not divisible by the row tile) -> cdiv/padding path.
    xr = jax.random.normal(jax.random.PRNGKey(1), (3, 5, dim), jnp.float32)
    out_r = jax.block_until_ready(ffn_apply(xr, params_bf16))
    assert out_r.shape == xr.shape
    assert jnp.allclose(out_r, ffn_reference(xr, w1, b1, w2, b2),
                        atol=5e-2, rtol=5e-2)

    # bf16 activations -> exercises the scratch-accumulator (non-f32 out) path.
    xb = x.astype(jnp.bfloat16)
    out_b = jax.block_until_ready(ffn_apply(xb, params_bf16))
    assert out_b.dtype == jnp.bfloat16 and out_b.shape == x.shape
    assert jnp.allclose(out_b.astype(jnp.float32), ref, atol=1e-1, rtol=1e-1)

    # Moderate shapes: exercises 256-lane alignment, multi-step ff reduction,
    # the row-tile split for the two v7x TensorCores and (when supported)
    # 3-deep buffering of the weight streams.
    dim2, ff2 = 256, 1024
    x2 = jax.random.normal(jax.random.PRNGKey(2), (4, 64, dim2), jnp.float32)
    w1b, b1b, w2b, b2b = init_ffn_params(jax.random.PRNGKey(3), dim2, ff2)
    params2 = prepare_ffn_params(w1b, b1b, w2b, b2b, tk_ff=256)
    out2 = jax.block_until_ready(ffn_apply(x2, params2))
    ref2 = ffn_reference(x2, w1b, b1b, w2b, b2b)
    assert out2.shape == x2.shape
    assert jnp.allclose(out2, ref2, atol=5e-2, rtol=5e-2)

    print("KERNEL_OK")
</pallas_src>

<mosaic_0001>
module attributes {stable_mosaic.version = 11 : i64} {
  func.func @_ffn_kernel_f32out(%arg0: i32, %arg1: i32, %arg2: i32, %arg3: memref<16x128xf32, #tpu.memory_space<vmem>>, %arg4: memref<128x128xf32, #tpu.memory_space<vmem>>, %arg5: memref<1x128xf32, #tpu.memory_space<vmem>>, %arg6: memref<128x128xf32, #tpu.memory_space<vmem>>, %arg7: memref<1x128xf32, #tpu.memory_space<vmem>>, %arg8: memref<16x128xf32, #tpu.memory_space<vmem>>) attributes {dimension_semantics = [#tpu.dimension_semantics<parallel>, #tpu.dimension_semantics<parallel>, #tpu.dimension_semantics<arbitrary>], iteration_bounds = array<i64: 1, 1, 1>, scalar_prefetch = 0 : i64, scratch_operands = 0 : i64, tpu.core_type = #tpu.core_type<tc>, window_params = [{transform_indices = @transform_0, window_bounds = array<i64: 16, 128>}, {transform_indices = @transform_1, window_bounds = array<i64: 128, 128>}, {transform_indices = @transform_2, window_bounds = array<i64: 1, 128>}, {transform_indices = @transform_3, window_bounds = array<i64: 128, 128>}, {transform_indices = @transform_4, window_bounds = array<i64: 1, 128>}, {transform_indices = @transform_5, window_bounds = array<i64: 16, 128>}]} {
    %c0_i32 = arith.constant 0 : i32
    %0 = arith.cmpi eq, %arg2, %c0_i32 : i32
    %1 = arith.extui %0 : i1 to i32
    %c0_i32_0 = arith.constant 0 : i32
    %2 = arith.cmpi ne, %1, %c0_i32_0 : i32
    scf.if %2 {
      %cst_16 = arith.constant 0.000000e+00 : f32
      %19 = vector.broadcast %cst_16 : f32 to vector<16x128xf32>
      %c0_17 = arith.constant 0 : index
      %c0_18 = arith.constant 0 : index
      %20 = vector.load %arg8[%c0_17, %c0_18] : memref<16x128xf32, #tpu.memory_space<vmem>>, vector<16x128xf32>
      tpu.vector_store %arg8[%c0_17, %c0_18], %19 {strides = array<i32>} : memref<16x128xf32, #tpu.memory_space<vmem>>, vector<16x128xf32>,
    } else {
    }
    %c0 = arith.constant 0 : index
    %c0_1 = arith.constant 0 : index
    %3 = vector.load %arg3[%c0, %c0_1] : memref<16x128xf32, #tpu.memory_space<vmem>>, vector<16x128xf32>
    %c0_2 = arith.constant 0 : index
    %c0_3 = arith.constant 0 : index
    %4 = vector.load %arg4[%c0_2, %c0_3] : memref<128x128xf32, #tpu.memory_space<vmem>>, vector<128x128xf32>
    %cst = arith.constant dense<0.000000e+00> : vector<16x128xf32>
    %5 = tpu.matmul %3, %4, %cst {dimension_numbers = #tpu.dot_dimension_numbers<[1], [0], [0], [1], [0, 0, 1, 1], [], []>} : vector<16x128xf32>, vector<128x128xf32>, vector<16x128xf32> -> vector<16x128xf32>
    %c0_4 = arith.constant 0 : index
    %c0_5 = arith.constant 0 : index
    %6 = vector.load %arg5[%c0_4, %c0_5] : memref<1x128xf32, #tpu.memory_space<vmem>>, vector<1x128xf32>
    %7 = vector.broadcast %6 : vector<1x128xf32> to vector<16x128xf32>
    %8 = arith.addf %5, %7 : vector<16x128xf32>
    %cst_6 = arith.constant 0.000000e+00 : f32
    %9 = vector.broadcast %cst_6 : f32 to vector<16x128xf32>
    %10 = arith.maximumf %8, %9 : vector<16x128xf32>
    %c0_7 = arith.constant 0 : index
    %c0_8 = arith.constant 0 : index
    %11 = vector.load %arg8[%c0_7, %c0_8] : memref<16x128xf32, #tpu.memory_space<vmem>>, vector<16x128xf32>
    %c0_9 = arith.constant 0 : index
    %c0_10 = arith.constant 0 : index
    %12 = vector.load %arg6[%c0_9, %c0_10] : memref<128x128xf32, #tpu.memory_space<vmem>>, vector<128x128xf32>
    %cst_11 = arith.constant dense<0.000000e+00> : vector<16x128xf32>
    %13 = tpu.matmul %10, %12, %cst_11 {dimension_numbers = #tpu.dot_dimension_numbers<[1], [0], [0], [1], [0, 0, 1, 1], [], []>} : vector<16x128xf32>, vector<128x128xf32>, vector<16x128xf32> -> vector<16x128xf32>
    %14 = arith.addf %11, %13 : vector<16x128xf32>
    %c0_12 = arith.constant 0 : index
    %c0_13 = arith.constant 0 : index
    %15 = vector.load %arg8[%c0_12, %c0_13] : memref<16x128xf32, #tpu.memory_space<vmem>>, vector<16x128xf32>
    tpu.vector_store %arg8[%c0_12, %c0_13], %14 {strides = array<i32>} : memref<16x128xf32, #tpu.memory_space<vmem>>, vector<16x128xf32>,
    %c0_i32_14 = arith.constant 0 : i32
    %16 = arith.cmpi eq, %arg2, %c0_i32_14 : i32
    %17 = arith.extui %16 : i1 to i32
    %c0_i32_15 = arith.constant 0 : i32
    %18 = arith.cmpi ne, %17, %c0_i32_15 : i32
    scf.if %18 {
      %c0_16 = arith.constant 0 : index
      %c0_17 = arith.constant 0 : index
      %19 = vector.load %arg8[%c0_16, %c0_17] : memref<16x128xf32, #tpu.memory_space<vmem>>, vector<16x128xf32>
      %c0_18 = arith.constant 0 : index
      %c0_19 = arith.constant 0 : index
      %20 = vector.load %arg7[%c0_18, %c0_19] : memref<1x128xf32, #tpu.memory_space<vmem>>, vector<1x128xf32>
      %21 = vector.broadcast %20 : vector<1x128xf32> to vector<16x128xf32>
      %22 = arith.addf %19, %21 : vector<16x128xf32>
      %c0_20 = arith.constant 0 : index
      %c0_21 = arith.constant 0 : index
      %23 = vector.load %arg8[%c0_20, %c0_21] : memref<16x128xf32, #tpu.memory_space<vmem>>, vector<16x128xf32>
      tpu.vector_store %arg8[%c0_20, %c0_21], %22 {strides = array<i32>} : memref<16x128xf32, #tpu.memory_space<vmem>>, vector<16x128xf32>,
    } else {
    }
    return
  }
  func.func @transform_0(%arg0: i32, %arg1: i32, %arg2: i32) -> (i32, i32) {
    %c0_i32 = arith.constant 0 : i32
    %c0_i32_0 = arith.constant 0 : i32
    return %arg0, %c0_i32 : i32, i32
  }
  func.func @transform_1(%arg0: i32, %arg1: i32, %arg2: i32) -> (i32, i32) {
    %c0_i32 = arith.constant 0 : i32
    %c0_i32_0 = arith.constant 0 : i32
    return %c0_i32, %arg2 : i32, i32
  }
  func.func @transform_2(%arg0: i32, %arg1: i32, %arg2: i32) -> (i32, i32) {
    %c0_i32 = arith.constant 0 : i32
    %c0_i32_0 = arith.constant 0 : i32
    return %c0_i32, %arg2 : i32, i32
  }
  func.func @transform_3(%arg0: i32, %arg1: i32, %arg2: i32) -> (i32, i32) {
    %c0_i32 = arith.constant 0 : i32
    return %arg2, %arg1 : i32, i32
  }
  func.func @transform_4(%arg0: i32, %arg1: i32, %arg2: i32) -> (i32, i32) {
    %c0_i32 = arith.constant 0 : i32
    %c0_i32_0 = arith.constant 0 : i32
    return %c0_i32, %arg1 : i32, i32
  }
  func.func @transform_5(%arg0: i32, %arg1: i32, %arg2: i32) -> (i32, i32) {
    %c0_i32 = arith.constant 0 : i32
    return %arg0, %arg1 : i32, i32
  }
}

</mosaic_0001>

<bundles_post_ra>
// kernel: tpu_custom_call.1
= control target key start
LH: loop header
LB: loop body
LE: loop exit
PB: predicated region body
PF: predicated region fallthrough
CT: control target
= control target key end

     0   :  { %10 = vsyncpa [#allocation3], 0  ;;  %s408_s0 = inlined_call_operand.hbm [shape: f32[16,128], index: 0, kind: input, shape index: {}]   ;;  %s409_s1 = inlined_call_operand.hbm [shape: f32[128,128], index: 1, kind: input, shape index: {}]   ;;  %s410_s2 = inlined_call_operand.vmem [shape: f32[1,128], index: 2, kind: input, shape index: {}]   ;;  %s411_s3 = inlined_call_operand.hbm [shape: f32[128,128], index: 3, kind: input, shape index: {}]   ;;  %s412_s4 = inlined_call_operand.vmem [shape: f32[1,128], index: 4, kind: input, shape index: {}]   ;;  %s413_s5 = inlined_call_operand.hbm [shape: f32[16,128], index: 5, kind: output, shape index: {}]  }
   0x1   :  { %11 = vsyncpa [#allocation6], 0 }
   0x2   :  { %12 = vsyncpa [#allocation4], 0  ;;  %s30_s20 = sshll.u32 %s409_s1, 4  ;;  %s342_s21 = smov [#allocation5]   ;;  %s31_s20 = int_to_ptr.hbm [resolvable:$true] %s30_s20 }
   0x3   :  { %s32_s22 = sshll.u32 %s342_s21, 4  ;;  %s17_s25 = sshll.u32 %s408_s0, 4  ;;  %s33_s22 = int_to_ptr.vmem [resolvable:$true] %s32_s22  ;;  %s18_s25 = int_to_ptr.hbm [resolvable:$true] %s17_s25 }
   0x4   :  { %s343_s26 = smov 128   ;;  %s344_s27 = smov 8  }
   0x5   :  { %38 = dma.hbm_to_vmem [thread:$0]  %s31_s20, 2048, %s33_s22, [#allocation6], %s343_s26, %s343_s26, %s344_s27  }
   0x6   :  { %s345_s28 = smov [#allocation2]   ;;  %s45_s1 = sshll.u32 %s411_s3, 4  ;;  %s46_s1 = int_to_ptr.hbm [resolvable:$true] %s45_s1 }
   0x7   :  { %s19_s29 = sshll.u32 %s345_s28, 4  ;;  %s346_s0 = smov [#allocation7]   ;;  %s20_s29 = int_to_ptr.vmem [resolvable:$true] %s19_s29 }
   0x8   :  { %25 = dma.hbm_to_vmem [thread:$0]  %s18_s25, 256, %s20_s29, [#allocation3], %s343_s26, %s343_s26, %s344_s27  }
   0x9   :  { %s47_s7 = sshll.u32 %s346_s0, 4  ;;  %s48_s7 = int_to_ptr.vmem [resolvable:$true] %s47_s7 }
   0xa   :  { %53 = dma.hbm_to_vmem [thread:$0]  %s46_s1, 2048, %s48_s7, [#allocation6], %s343_s26, %s343_s26, %s344_s27  }
   0xb   :  { %336 = dma.done.wait [#allocation3], 256  }
   0xc   :  { %337 = vsyncadd [#allocation3], 4294967040 }
   0xd   :  { %338 = dma.done.wait [#allocation6], 4096  }
   0xe   :  { %339 = vsyncadd [#allocation6], 4294963200  ;;  %v91_v0 = vld [vmem:[#allocation5 + $0x78] sm:$0xff]  ;;  %v90_v1 = vld [vmem:[#allocation5 + $0x70] sm:$0xff]  ;;  %s347_s11 = smov [#allocation8]   ;;  %s185_s14 = sshll.u32 %s413_s5, 4  ;;  %s186_s14 = int_to_ptr.hbm [resolvable:$true] %s185_s14 }
   0xf   :  { %199 = vmatpush.msra.mxu2 %v91_v0  ;;  %96 = vmatpush.msra.mxu0 %v91_v0  ;;  %v89_v2 = vld [vmem:[#allocation5 + $0x68] sm:$0xff]  ;;  %v88_v3 = vld [vmem:[#allocation5 + $0x60] sm:$0xff]  ;;  %v87_v4 = vld [vmem:[#allocation5 + $0x58] sm:$0xff]  ;;  %s183_s12 = sshll.u32 %s347_s11, 4  ;;  %s184_s12 = int_to_ptr.vmem [resolvable:$true] %s183_s12 }
  0x10   :  { %v138_v5 = vld [vmem:[#allocation7 + $0x78] sm:$0xff]  ;;  %v137_v6 = vld [vmem:[#allocation7 + $0x70] sm:$0xff]  ;;  %v136_v8 = vld [vmem:[#allocation7 + $0x68] sm:$0xff] }
  0x11   :  { %200 = vmatpush.msra.mxu2 %v90_v1  ;;  %97 = vmatpush.msra.mxu0 %v90_v1  ;;  %v86_v7 = vld [vmem:[#allocation5 + $0x50] sm:$0xff]  ;;  %v85_v9 = vld [vmem:[#allocation5 + $0x48] sm:$0xff]  ;;  %v135_v10 = vld [vmem:[#allocation7 + $0x60] sm:$0xff] }
  0x12   :  { %215 = vmatpush.msra.mxu3 %v138_v5  ;;  %139 = vmatpush.msra.mxu1 %v138_v5  ;;  %v84_v11 = vld [vmem:[#allocation5 + $0x40] sm:$0xff]  ;;  %v134_v12 = vld [vmem:[#allocation7 + $0x58] sm:$0xff]  ;;  %v133_v14 = vld [vmem:[#allocation7 + $0x50] sm:$0xff] }
  0x13   :  { %201 = vmatpush.msra.mxu2 %v89_v2  ;;  %98 = vmatpush.msra.mxu0 %v89_v2  ;;  %v83_v13 = vld [vmem:[#allocation5 + $0x38] sm:$0xff]  ;;  %v82_v15 = vld [vmem:[#allocation5 + $0x30] sm:$0xff]  ;;  %v132_v16 = vld [vmem:[#allocation7 + $0x48] sm:$0xff] }
  0x14   :  { %216 = vmatpush.msra.mxu3 %v137_v6  ;;  %140 = vmatpush.msra.mxu1 %v137_v6  ;;  %v81_v17 = vld [vmem:[#allocation5 + $0x28] sm:$0xff]  ;;  %v131_v18 = vld [vmem:[#allocation7 + $0x40] sm:$0xff]  ;;  %v130_v20 = vld [vmem:[#allocation7 + $0x38] sm:$0xff] }
  0x15   :  { %202 = vmatpush.msra.mxu2 %v88_v3  ;;  %99 = vmatpush.msra.mxu0 %v88_v3  ;;  %v80_v19 = vld [vmem:[#allocation5 + $0x20] sm:$0xff]  ;;  %v79_v21 = vld [vmem:[#allocation5 + $0x18] sm:$0xff]  ;;  %v129_v22 = vld [vmem:[#allocation7 + $0x30] sm:$0xff] }
  0x16   :  { %217 = vmatpush.msra.mxu3 %v136_v8  ;;  %141 = vmatpush.msra.mxu1 %v136_v8  ;;  %v78_v23 = vld [vmem:[#allocation5 + $0x10] sm:$0xff]  ;;  %v128_v24 = vld [vmem:[#allocation7 + $0x28] sm:$0xff]  ;;  %v127_v26 = vld [vmem:[#allocation7 + $0x20] sm:$0xff] }
  0x17   :  { %203 = vmatpush.msra.mxu2 %v87_v4  ;;  %100 = vmatpush.msra.mxu0 %v87_v4  ;;  %v77_v25 = vld [vmem:[#allocation5 + $0x8] sm:$0xff]  ;;  %v76_v27 = vld [vmem:[#allocation5] sm:$0xff]  ;;  %v75_v28 = vld [vmem:[#allocation2 + $0x8] sm:$0xff] }
  0x18   :  { %218 = vmatpush.msra.mxu3 %v135_v10  ;;  %142 = vmatpush.msra.mxu1 %v135_v10  ;;  %v74_v29 = vld [vmem:[#allocation2] sm:$0xff]  ;;  %v126_v30 = vld [vmem:[#allocation7 + $0x18] sm:$0xff]  ;;  %v124_v32 = vld [vmem:[#allocation7 + $0x8] sm:$0xff] }
  0x19   :  { %204 = vmatpush.msra.mxu2 %v86_v7  ;;  %101 = vmatpush.msra.mxu0 %v86_v7  ;;  %v125_v31 = vld [vmem:[#allocation7 + $0x10] sm:$0xff]  ;;  %v123_v33 = vld [vmem:[#allocation7] sm:$0xff] }
  0x1a   :  { %219 = vmatpush.msra.mxu3 %v134_v12  ;;  %143 = vmatpush.msra.mxu1 %v134_v12  ;;  %v238_v34 = vld [vmem:[%s410_s2] ss:$0 sm:$0xff] }
  0x1b   :  { %205 = vmatpush.msra.mxu2 %v85_v9  ;;  %102 = vmatpush.msra.mxu0 %v85_v9  ;;  %v239_v41 = vld [vmem:[%s412_s4] ss:$0 sm:$0xff] }
  0x1c   :  { %220 = vmatpush.msra.mxu3 %v133_v14  ;;  %144 = vmatpush.msra.mxu1 %v133_v14 }
  0x1d   :  { %206 = vmatpush.msra.mxu2 %v84_v11  ;;  %103 = vmatpush.msra.mxu0 %v84_v11 }
  0x1e   :  { %221 = vmatpush.msra.mxu3 %v132_v16  ;;  %145 = vmatpush.msra.mxu1 %v132_v16 }
  0x1f   :  { %207 = vmatpush.msra.mxu2 %v83_v13  ;;  %104 = vmatpush.msra.mxu0 %v83_v13 }
  0x20   :  { %222 = vmatpush.msra.mxu3 %v131_v18  ;;  %146 = vmatpush.msra.mxu1 %v131_v18 }
  0x21   :  { %208 = vmatpush.msra.mxu2 %v82_v15  ;;  %105 = vmatpush.msra.mxu0 %v82_v15 }
  0x22   :  { %223 = vmatpush.msra.mxu3 %v130_v20  ;;  %147 = vmatpush.msra.mxu1 %v130_v20 }
  0x23   :  { %209 = vmatpush.msra.mxu2 %v81_v17  ;;  %106 = vmatpush.msra.mxu0 %v81_v17 }
  0x24   :  { %224 = vmatpush.msra.mxu3 %v129_v22  ;;  %148 = vmatpush.msra.mxu1 %v129_v22 }
  0x25   :  { %210 = vmatpush.msra.mxu2 %v80_v19  ;;  %107 = vmatpush.msra.mxu0 %v80_v19 }
  0x26   :  { %225 = vmatpush.msra.mxu3 %v128_v24  ;;  %149 = vmatpush.msra.mxu1 %v128_v24 }
  0x27   :  { %211 = vmatpush.msra.mxu2 %v79_v21  ;;  %108 = vmatpush.msra.mxu0 %v79_v21 }
  0x28   :  { %226 = vmatpush.msra.mxu3 %v127_v26  ;;  %150 = vmatpush.msra.mxu1 %v127_v26 }
  0x29   :  { %212 = vmatpush.msra.mxu2 %v78_v23  ;;  %109 = vmatpush.msra.mxu0 %v78_v23 }
  0x2a   :  { %227 = vmatpush.msra.mxu3 %v126_v30  ;;  %151 = vmatpush.msra.mxu1 %v126_v30 }
  0x2b   :  { %213 = vmatpush.msra.mxu2 %v77_v25  ;;  %110 = vmatpush.msra.mxu0 %v77_v25 }
  0x2c   :  { %228 = vmatpush.msra.mxu3 %v125_v31  ;;  %152 = vmatpush.msra.mxu1 %v125_v31 }
  0x2d   :  { %214 = vmatpush.msra.mxu2 %v76_v27  ;;  %111 = vmatpush.msra.mxu0 %v76_v27 }
  0x2e   :  { %115 = vmatmul.f32.vlgmr.msra.gmra.mxu2 %v75_v28  ;;  %112 = vmatmul.f32.vlgmr.msra.gmra.mxu0 %v74_v29 }
  0x2f   :  { %229 = vmatpush.msra.mxu3 %v124_v32  ;;  %153 = vmatpush.msra.mxu1 %v124_v32 }
  0x31   :  { %230 = vmatpush.msra.mxu3 %v123_v33  ;;  %154 = vmatpush.msra.mxu1 %v123_v33 }
  0xab   :  { %v113_v35 = vpop.f32.mrf.mxu0 }
  0xac   :  { %v114_v36 = vadd.f32 %v238_v34, %v113_v35 }
  0xae   :  { %v119_v37 = vmax.f32 %v114_v36, 0.0 }
  0xb0   :  { %155 = vmatmul.f32.vlgmr.msra.gmra.mxu1 %v119_v37 }
  0xb1   :  { %v116_v38 = vpop.f32.mrf.mxu2 }
  0xb2   :  { %v117_v39 = vadd.f32 %v238_v34, %v116_v38 }
  0xb4   :  { %v120_v40 = vmax.f32 %v117_v39, 0.0 }
  0xb6   :  { %158 = vmatmul.f32.vlgmr.msra.gmra.mxu3 %v120_v40 }
 0x12d   :  { %v156_v42 = vpop.f32.mrf.mxu1 }
 0x12e   :  { %v175_v43 = vadd.f32 %v239_v41, %v156_v42 }
 0x130   :  { %177 = vst [vmem:[#allocation8] sm:$0xff] %v175_v43 }
 0x139   :  { %v159_v44 = vpop.f32.mrf.mxu3 }
 0x13a   :  { %v176_v45 = vadd.f32 %v239_v41, %v159_v44 }
 0x13c   :  { %178 = vst [vmem:[#allocation8 + $0x8] sm:$0xff] %v176_v45 }
 0x13d   :  { %191 = dma.vmem_to_hbm [thread:$0]  %s184_s12, 256, %s186_s14, [#allocation4], %s343_s26, %s343_s26, %s344_s27  }
 0x13e   :  { %340 = dma.done.wait [#allocation4], 256  }
 0x13f   :  { %341 = vsyncadd [#allocation4], 4294967040 }
 0x140   :  { %196 = vsyncpa [#allocation3], 1 }
 0x141   :  { %197 = vsyncpa [#allocation6], 1 }
 0x142   :  { %198 = vsyncpa [#allocation4], 1 }

</bundles_post_ra>
